<compile_context>
chip_gen: v7x
topology: tpu7x:2x2x1
jax: 0.10.0
libtpu: 0.0.40
codegen_flags: <defaults>
</compile_context>

<pallas_src>
import jax
import jax.numpy as jnp
from jax import lax
from jax.experimental import pallas as pl
from jax.experimental.pallas import tpu as pltpu


# SMEM accumulator slots (per batch-block, reset at t == 0):
#   0: sum |mel_pred  - mel_tgt| over valid frames
#   1: sum |post_pred - mel_tgt| over valid frames
#   2: sum ((log_dur_pred - log(dur_tgt + 1))^2) over valid src positions
#   3: sum (1 + logvar - mu^2 - exp(logvar))           (KL, unmasked)
def _loss_partials_kernel(mel_len_ref, src_len_ref,
                          mel_tgt_ref, mel_pred_ref, post_pred_ref,
                          dur_pred_ref, dur_tgt_ref, mu_ref, logvar_ref,
                          out_ref, acc_ref):
    b = pl.program_id(0)
    t = pl.program_id(1)
    b_tile, t_tile, _ = mel_tgt_ref.shape

    # ---- once per batch block: zero mel accumulators, duration MSE + KL -----
    @pl.when(t == 0)
    def _():
        acc_ref[0] = jnp.float32(0.0)
        acc_ref[1] = jnp.float32(0.0)

        t_src = dur_pred_ref.shape[-1]
        row3 = lax.broadcasted_iota(jnp.int32, (b_tile, 1, 1), 0)
        src_len = jnp.zeros((b_tile, 1, 1), jnp.int32)
        for i in range(b_tile):                     # b_tile is small & static
            src_len = jnp.where(row3 == i, src_len_ref[b * b_tile + i], src_len)
        pos = lax.broadcasted_iota(jnp.int32, (b_tile, 1, t_src), 2)
        src_valid = pos < src_len

        log_dur_tgt = jnp.log(dur_tgt_ref[...].astype(jnp.float32) + 1.0)
        diff = dur_pred_ref[...].astype(jnp.float32) - log_dur_tgt
        acc_ref[2] = jnp.sum(jnp.where(src_valid, diff * diff, 0.0))

        mu = mu_ref[...].astype(jnp.float32)
        logvar = logvar_ref[...].astype(jnp.float32)
        acc_ref[3] = jnp.sum(1.0 + logvar - mu * mu - jnp.exp(logvar))

    # ---- masked mel / postnet L1 partial sums for this (b-block, t-tile) ----
    row = lax.broadcasted_iota(jnp.int32, (b_tile, 1), 0)
    mel_len = jnp.zeros((b_tile, 1), jnp.int32)
    for i in range(b_tile):
        mel_len = jnp.where(row == i, mel_len_ref[b * b_tile + i], mel_len)
    frame_idx = t * t_tile + lax.broadcasted_iota(jnp.int32, (b_tile, t_tile), 1)
    # One comparison handles both the padding mask and tail-tile OOB frames.
    valid = frame_idx < mel_len

    mel_tgt = mel_tgt_ref[...].astype(jnp.float32)     # (b_tile, t_tile, n_mel)
    mel_pred = mel_pred_ref[...].astype(jnp.float32)
    post_pred = post_pred_ref[...].astype(jnp.float32)

    # Reduce over the narrow n_mel axis first -> no (.., n_mel) mask broadcast.
    abs_mel = jnp.sum(jnp.abs(mel_pred - mel_tgt), axis=-1)    # (b_tile, t_tile)
    abs_post = jnp.sum(jnp.abs(post_pred - mel_tgt), axis=-1)

    # jnp.where (not multiply) is NaN-safe against unspecified OOB padding.
    acc_ref[0] += jnp.sum(jnp.where(valid, abs_mel, 0.0))
    acc_ref[1] += jnp.sum(jnp.where(valid, abs_post, 0.0))

    # ---- last T tile of this batch block: emit the 4 partial sums -----------
    @pl.when(t == pl.num_programs(1) - 1)
    def _():
        slot = lax.broadcasted_iota(jnp.int32, (1, 4, 1), 1)
        vals = jnp.zeros((1, 4, 1), jnp.float32)
        for i in range(4):
            vals = jnp.where(slot == i, acc_ref[i], vals)
        out_ref[...] = vals


def _round_up(x, m):
    return ((x + m - 1) // m) * m


def _buf_bytes(b, sub, lane, itemsize):
    """Double-buffered VMEM footprint of one (b, sub, lane) block."""
    return 2 * b * _round_up(max(sub, 1), 8) * _round_up(max(lane, 1), 128) * itemsize


def fastspeech2_loss(mel_targets, duration_targets,
                     mel_predictions, mu, logvar, postnet_mel_predictions,
                     log_duration_predictions, src_masks, mel_masks,
                     beta, *, frames_per_step=4096):
    """Pallas implementation of FastSpeech2Loss.forward.

    src_masks / mel_masks are boolean with True == padding (PyTorch
    convention).  They are assumed to be prefix (length) masks, which is the
    FastSpeech2 convention; valid positions are recomputed in-kernel from the
    per-row lengths.
    Returns (total_loss, mel_loss, kl_loss, postnet_mel_loss, duration_loss).
    """
    batch, t_mel = mel_masks.shape
    n_mel = mel_predictions.shape[-1]
    t_src = src_masks.shape[1]
    latent = mu.shape[-1]

    # Per-row valid lengths (tiny XLA reductions; prefix-mask assumption).
    mel_lens = jnp.sum(jnp.logical_not(mel_masks), axis=1).astype(jnp.int32)
    src_lens = jnp.sum(jnp.logical_not(src_masks), axis=1).astype(jnp.int32)

    # Tiny per-row arrays -> (B, 1, W) so the constrained (last two) block
    # dims are full-extent and b_tile stays unconstrained.
    dur_pred3 = log_duration_predictions[:, None, :]        # (B, 1, Ts)
    dur_tgt3 = duration_targets[:, None, :]                 # (B, 1, Ts)
    mu3 = mu[:, None, :]                                    # (B, 1, L)
    logvar3 = logvar[:, None, :]                            # (B, 1, L)

    # ---- tile sizing (bytes per grid step is the lever on this HBM-bound op)
    itemsizes = (mel_targets.dtype.itemsize,
                 mel_predictions.dtype.itemsize,
                 postnet_mel_predictions.dtype.itemsize)
    bytes_per_frame = 2 * _round_up(n_mel, 128) * sum(itemsizes)
    # Keep the double-buffered mel tiles <= ~32 MiB so the same schedule fits
    # v5e / v6e / v7x (v7x has only 64 MiB physical VMEM per TensorCore).
    frames_cap = max(8, (32 << 20) // bytes_per_frame)
    frames_per_step = max(8, min(int(frames_per_step), frames_cap))

    # Batch block: <= 8, and <= B // 2 so the "parallel" axis has >= 2 grid
    # points whenever B >= 2 (v7x has two TensorCores).
    # TODO(synk): for B == 1 on v7x the second TensorCore idles; a T-axis
    # parallel split would recover it but is not implemented here.
    b_cap = 1 if batch < 2 else min(8, batch // 2)
    b_tile = max(d for d in range(1, b_cap + 1) if batch % d == 0)
    n_b = batch // b_tile

    t_budget = max(8, frames_per_step // b_tile)
    t_tile = min(t_mel, t_budget)
    t_tile = _round_up(t_tile, 8)          # (8,128) sublane rule; OOB masked in-kernel
    n_t = pl.cdiv(t_mel, t_tile)

    mel_spec = pl.BlockSpec((b_tile, t_tile, n_mel), lambda b, t, *_: (b, t, 0))

    def row_spec(width):
        return pl.BlockSpec((b_tile, 1, width), lambda b, t, *_: (b, 0, 0))

    # ---- explicit VMEM budget (inputs are double-buffered by BlockSpec) -----
    vmem_bytes = sum(_buf_bytes(b_tile, t_tile, n_mel, it) for it in itemsizes)
    vmem_bytes += _buf_bytes(b_tile, 1, t_src, dur_pred3.dtype.itemsize)
    vmem_bytes += _buf_bytes(b_tile, 1, t_src, dur_tgt3.dtype.itemsize)
    vmem_bytes += _buf_bytes(b_tile, 1, latent, mu3.dtype.itemsize)
    vmem_bytes += _buf_bytes(b_tile, 1, latent, logvar3.dtype.itemsize)
    vmem_bytes += _buf_bytes(1, 4, 1, 4)                      # output block
    vmem_limit = int(vmem_bytes + (8 << 20))                  # headroom for the compiler

    ins = (mel_targets, mel_predictions, postnet_mel_predictions,
           dur_pred3, dur_tgt3, mu3, logvar3)
    bytes_accessed = (sum(int(x.size) * int(x.dtype.itemsize) for x in ins)
                      + 2 * batch * 4 + n_b * 4 * 4)
    cost = pl.CostEstimate(
        flops=8 * batch * t_mel * n_mel + 8 * batch * (t_src + latent),
        transcendentals=batch * (t_src + latent),
        bytes_accessed=bytes_accessed)

    grid_spec = pltpu.PrefetchScalarGridSpec(
        num_scalar_prefetch=2,                         # mel_lens, src_lens -> SMEM
        grid=(n_b, n_t),
        in_specs=[mel_spec, mel_spec, mel_spec,
                  row_spec(t_src), row_spec(t_src),
                  row_spec(latent), row_spec(latent)],
        out_specs=pl.BlockSpec((1, 4, 1), lambda b, t, *_: (b, 0, 0)),
        scratch_shapes=[pltpu.SMEM((4,), jnp.float32)])

    partials = pl.pallas_call(
        _loss_partials_kernel,
        grid_spec=grid_spec,
        out_shape=jax.ShapeDtypeStruct((n_b, 4, 1), jnp.float32),
        compiler_params=pltpu.CompilerParams(
            dimension_semantics=("parallel", "arbitrary"),
            vmem_limit_bytes=vmem_limit),
        cost_estimate=cost,
    )(mel_lens, src_lens, *ins)

    # Final combine: a handful of scalar ops in plain JAX (beta applied here so
    # a KL-annealing schedule never forces a kernel recompile).
    p = jnp.sum(partials[:, :, 0], axis=0)                    # (4,)
    mel_sel = jnp.sum(mel_lens).astype(jnp.float32) * jnp.float32(n_mel)
    src_sel = jnp.sum(src_lens).astype(jnp.float32)
    mel_loss = p[0] / mel_sel
    postnet_mel_loss = p[1] / mel_sel
    duration_loss = p[2] / src_sel
    kl_loss = -0.5 * p[3] / jnp.float32(batch * latent)
    total_loss = mel_loss + postnet_mel_loss + duration_loss + beta * kl_loss
    return total_loss, mel_loss, kl_loss, postnet_mel_loss, duration_loss


def _reference(mel_targets, duration_targets,
               mel_predictions, mu, logvar, postnet_mel_predictions,
               log_duration_predictions, src_masks, mel_masks, beta):
    """Pure-JAX reference mirroring the PyTorch module (masked_select + mean)."""
    t_mel = mel_masks.shape[1]
    n_mel = mel_predictions.shape[-1]
    mel_targets = mel_targets[:, :t_mel, :].astype(jnp.float32)
    mel_predictions = mel_predictions[:, :t_mel, :].astype(jnp.float32)
    postnet = postnet_mel_predictions[:, :t_mel, :].astype(jnp.float32)
    mel_valid = ~mel_masks
    src_valid = ~src_masks
    log_dur_tgt = jnp.log(duration_targets.astype(jnp.float32) + 1.0)

    m3 = mel_valid[:, :, None]
    # masked_select broadcasts the (B,T,1) mask over n_mel -> count = frames * n_mel
    n_sel = jnp.sum(m3).astype(jnp.float32) * jnp.float32(n_mel)
    mel_loss = jnp.sum(jnp.abs(mel_predictions - mel_targets) * m3) / n_sel
    post_loss = jnp.sum(jnp.abs(postnet - mel_targets) * m3) / n_sel
    dur_loss = (jnp.sum(((log_duration_predictions - log_dur_tgt) ** 2) * src_valid)
                / jnp.sum(src_valid))
    kl = -0.5 * jnp.mean(1.0 + logvar - mu * mu - jnp.exp(logvar))
    total = mel_loss + post_loss + dur_loss + beta * kl
    return total, mel_loss, kl, post_loss, dur_loss


if __name__ == "__main__":
    key = jax.random.PRNGKey(0)
    ks = jax.random.split(key, 8)
    BETA = 0.01   # model_config['vae']['beta']

    def run_case(B, T_MEL, N_MEL, T_SRC, LATENT, mel_lens, src_lens, frames_per_step):
        mel_targets = jax.random.normal(ks[0], (B, T_MEL, N_MEL), jnp.float32)
        mel_predictions = jax.random.normal(ks[1], (B, T_MEL, N_MEL), jnp.float32)
        postnet_mel_predictions = jax.random.normal(ks[2], (B, T_MEL, N_MEL), jnp.float32)
        duration_targets = jax.random.randint(ks[3], (B, T_SRC), 0, 10).astype(jnp.int32)
        log_duration_predictions = jax.random.normal(ks[4], (B, T_SRC), jnp.float32)
        mu = jax.random.normal(ks[5], (B, LATENT), jnp.float32)
        logvar = 0.1 * jax.random.normal(ks[6], (B, LATENT), jnp.float32)

        # PyTorch-style masks: True == padding (prefix / length masks).
        mel_masks = (jnp.arange(T_MEL)[None, :]
                     >= jnp.asarray(mel_lens, jnp.int32)[:, None])
        src_masks = (jnp.arange(T_SRC)[None, :]
                     >= jnp.asarray(src_lens, jnp.int32)[:, None])

        got = fastspeech2_loss(
            mel_targets, duration_targets,
            mel_predictions, mu, logvar, postnet_mel_predictions,
            log_duration_predictions, src_masks, mel_masks, BETA,
            frames_per_step=frames_per_step)
        got = jax.block_until_ready(got)

        want = _reference(
            mel_targets, duration_targets,
            mel_predictions, mu, logvar, postnet_mel_predictions,
            log_duration_predictions, src_masks, mel_masks, BETA)

        for g, w in zip(got, want):
            assert jnp.allclose(g, w, rtol=1e-5, atol=1e-5), (g, w)

    # Single T tile, b_tile = 1 (two parallel batch grid points).
    run_case(B=2, T_MEL=16, N_MEL=8, T_SRC=8, LATENT=16,
             mel_lens=[16, 12], src_lens=[8, 6], frames_per_step=4096)
    # Multi T tile with running SMEM accumulators + batch blocking (b_tile = 2).
    run_case(B=4, T_MEL=32, N_MEL=8, T_SRC=8, LATENT=16,
             mel_lens=[32, 21, 7, 30], src_lens=[8, 5, 3, 8], frames_per_step=16)
    # Tail tile: T_MEL not a multiple of the rounded tile (OOB frames masked).
    run_case(B=2, T_MEL=20, N_MEL=8, T_SRC=8, LATENT=16,
             mel_lens=[20, 13], src_lens=[8, 4], frames_per_step=8)

    print("KERNEL_OK")
</pallas_src>

<mosaic_0001>
module attributes {stable_mosaic.version = 11 : i64} {
  func.func @_loss_partials_kernel(%arg0: i32, %arg1: i32, %arg2: memref<2xi32, #tpu.memory_space<smem>>, %arg3: memref<2xi32, #tpu.memory_space<smem>>, %arg4: memref<1x16x8xf32, #tpu.memory_space<vmem>>, %arg5: memref<1x16x8xf32, #tpu.memory_space<vmem>>, %arg6: memref<1x16x8xf32, #tpu.memory_space<vmem>>, %arg7: memref<1x1x8xf32, #tpu.memory_space<vmem>>, %arg8: memref<1x1x8xi32, #tpu.memory_space<vmem>>, %arg9: memref<1x1x16xf32, #tpu.memory_space<vmem>>, %arg10: memref<1x1x16xf32, #tpu.memory_space<vmem>>, %arg11: memref<1x4x1xf32, #tpu.memory_space<vmem>>, %arg12: memref<4xf32, #tpu.memory_space<smem>>) attributes {dimension_semantics = [#tpu.dimension_semantics<parallel>, #tpu.dimension_semantics<arbitrary>], iteration_bounds = array<i64: 2, 1>, scalar_prefetch = 2 : i64, scratch_operands = 1 : i64, tpu.core_type = #tpu.core_type<tc>, window_params = [{transform_indices = @transform_0, window_bounds = array<i64: 1, 16, 8>}, {transform_indices = @transform_1, window_bounds = array<i64: 1, 16, 8>}, {transform_indices = @transform_2, window_bounds = array<i64: 1, 16, 8>}, {transform_indices = @transform_3, window_bounds = array<i64: 1, 1, 8>}, {transform_indices = @transform_4, window_bounds = array<i64: 1, 1, 8>}, {transform_indices = @transform_5, window_bounds = array<i64: 1, 1, 16>}, {transform_indices = @transform_6, window_bounds = array<i64: 1, 1, 16>}, {transform_indices = @transform_7, window_bounds = array<i64: 1, 4, 1>}]} {
    %c0_i32 = arith.constant 0 : i32
    %0 = arith.cmpi eq, %arg1, %c0_i32 : i32
    %1 = arith.extui %0 : i1 to i32
    %c0_i32_0 = arith.constant 0 : i32
    %2 = arith.cmpi ne, %1, %c0_i32_0 : i32
    scf.if %2 {
      %cst_22 = arith.constant 0.000000e+00 : f32
      %c0_23 = arith.constant 0 : index
      %49 = memref.load %arg12[%c0_23] : memref<4xf32, #tpu.memory_space<smem>>
      memref.store %cst_22, %arg12[%c0_23] : memref<4xf32, #tpu.memory_space<smem>>
      %cst_24 = arith.constant 0.000000e+00 : f32
      %c1_25 = arith.constant 1 : index
      %50 = memref.load %arg12[%c1_25] : memref<4xf32, #tpu.memory_space<smem>>
      memref.store %cst_24, %arg12[%c1_25] : memref<4xf32, #tpu.memory_space<smem>>
      %51 = tpu.iota {dimensions = array<i32: 0>} : vector<1x1x1xi32>
      %c0_i32_26 = arith.constant 0 : i32
      %52 = vector.broadcast %c0_i32_26 : i32 to vector<1x1x1xi32>
      %c0_i32_27 = arith.constant 0 : i32
      %53 = vector.broadcast %c0_i32_27 : i32 to vector<1x1x1xi32>
      %54 = arith.cmpi eq, %51, %53 : vector<1x1x1xi32>
      %c1_i32_28 = arith.constant 1 : i32
      %55 = arith.muli %arg0, %c1_i32_28 : i32
      %c0_i32_29 = arith.constant 0 : i32
      %56 = arith.addi %55, %c0_i32_29 : i32
      %57 = arith.index_cast %56 : i32 to index
      %58 = memref.load %arg3[%57] : memref<2xi32, #tpu.memory_space<smem>>
      %59 = vector.broadcast %58 : i32 to vector<1x1x1xi32>
      %60 = arith.select %54, %59, %52 : vector<1x1x1xi1>, vector<1x1x1xi32>
      %61 = tpu.iota {dimensions = array<i32: 2>} : vector<1x1x8xi32>
      %62 = vector.broadcast %60 : vector<1x1x1xi32> to vector<1x1x8xi32>
      %63 = arith.cmpi slt, %61, %62 : vector<1x1x8xi32>
      %c0_30 = arith.constant 0 : index
      %c0_31 = arith.constant 0 : index
      %c0_32 = arith.constant 0 : index
      %64 = vector.load %arg8[%c0_30, %c0_31, %c0_32] : memref<1x1x8xi32, #tpu.memory_space<vmem>>, vector<1x1x8xi32>
      %65 = arith.sitofp %64 : vector<1x1x8xi32> to vector<1x1x8xf32>
      %cst_33 = arith.constant 1.000000e+00 : f32
      %66 = vector.broadcast %cst_33 : f32 to vector<1x1x8xf32>
      %67 = arith.addf %65, %66 : vector<1x1x8xf32>
      %68 = math.log %67 : vector<1x1x8xf32>
      %c0_34 = arith.constant 0 : index
      %c0_35 = arith.constant 0 : index
      %c0_36 = arith.constant 0 : index
      %69 = vector.load %arg7[%c0_34, %c0_35, %c0_36] : memref<1x1x8xf32, #tpu.memory_space<vmem>>, vector<1x1x8xf32>
      %70 = arith.subf %69, %68 : vector<1x1x8xf32>
      %71 = arith.mulf %70, %70 : vector<1x1x8xf32>
      %cst_37 = arith.constant 0.000000e+00 : f32
      %72 = vector.broadcast %cst_37 : f32 to vector<1x1x8xf32>
      %73 = arith.select %63, %71, %72 : vector<1x1x8xi1>, vector<1x1x8xf32>
      %74 = vector.shape_cast %73 : vector<1x1x8xf32> to vector<1x1x1x8xf32>
      %cst_38 = arith.constant dense<0.000000e+00> : vector<1xf32>
      %75 = vector.multi_reduction <add>, %74, %cst_38 [1, 2, 3] : vector<1x1x1x8xf32> to vector<1xf32>
      %76 = vector.shape_cast %75 : vector<1xf32> to vector<1x1x1x1xf32>
      %77 = vector.extract %76[0, 0, 0, 0] : f32 from vector<1x1x1x1xf32>
      %c2 = arith.constant 2 : index
      %78 = memref.load %arg12[%c2] : memref<4xf32, #tpu.memory_space<smem>>
      memref.store %77, %arg12[%c2] : memref<4xf32, #tpu.memory_space<smem>>
      %c0_39 = arith.constant 0 : index
      %c0_40 = arith.constant 0 : index
      %c0_41 = arith.constant 0 : index
      %79 = vector.load %arg9[%c0_39, %c0_40, %c0_41] : memref<1x1x16xf32, #tpu.memory_space<vmem>>, vector<1x1x16xf32>
      %c0_42 = arith.constant 0 : index
      %c0_43 = arith.constant 0 : index
      %c0_44 = arith.constant 0 : index
      %80 = vector.load %arg10[%c0_42, %c0_43, %c0_44] : memref<1x1x16xf32, #tpu.memory_space<vmem>>, vector<1x1x16xf32>
      %cst_45 = arith.constant 1.000000e+00 : f32
      %81 = vector.broadcast %cst_45 : f32 to vector<1x1x16xf32>
      %82 = arith.addf %81, %80 : vector<1x1x16xf32>
      %83 = arith.mulf %79, %79 : vector<1x1x16xf32>
      %84 = arith.subf %82, %83 : vector<1x1x16xf32>
      %85 = math.exp %80 : vector<1x1x16xf32>
      %86 = arith.subf %84, %85 : vector<1x1x16xf32>
      %87 = vector.shape_cast %86 : vector<1x1x16xf32> to vector<1x1x1x16xf32>
      %cst_46 = arith.constant dense<0.000000e+00> : vector<1xf32>
      %88 = vector.multi_reduction <add>, %87, %cst_46 [1, 2, 3] : vector<1x1x1x16xf32> to vector<1xf32>
      %89 = vector.shape_cast %88 : vector<1xf32> to vector<1x1x1x1xf32>
      %90 = vector.extract %89[0, 0, 0, 0] : f32 from vector<1x1x1x1xf32>
      %c3 = arith.constant 3 : index
      %91 = memref.load %arg12[%c3] : memref<4xf32, #tpu.memory_space<smem>>
      memref.store %90, %arg12[%c3] : memref<4xf32, #tpu.memory_space<smem>>
    } else {
    }
    %3 = tpu.iota {dimensions = array<i32: 0>} : vector<1x1xi32>
    %c0_i32_1 = arith.constant 0 : i32
    %4 = vector.broadcast %c0_i32_1 : i32 to vector<1x1xi32>
    %c0_i32_2 = arith.constant 0 : i32
    %5 = vector.broadcast %c0_i32_2 : i32 to vector<1x1xi32>
    %6 = arith.cmpi eq, %3, %5 : vector<1x1xi32>
    %c1_i32 = arith.constant 1 : i32
    %7 = arith.muli %arg0, %c1_i32 : i32
    %c0_i32_3 = arith.constant 0 : i32
    %8 = arith.addi %7, %c0_i32_3 : i32
    %9 = arith.index_cast %8 : i32 to index
    %10 = memref.load %arg2[%9] : memref<2xi32, #tpu.memory_space<smem>>
    %11 = vector.broadcast %10 : i32 to vector<1x1xi32>
    %12 = arith.select %6, %11, %4 : vector<1x1xi1>, vector<1x1xi32>
    %c16_i32 = arith.constant 16 : i32
    %13 = arith.muli %arg1, %c16_i32 : i32
    %14 = tpu.iota {dimensions = array<i32: 1>} : vector<1x16xi32>
    %15 = vector.broadcast %13 : i32 to vector<1x16xi32>
    %16 = arith.addi %15, %14 : vector<1x16xi32>
    %17 = vector.broadcast %12 : vector<1x1xi32> to vector<1x16xi32>
    %18 = arith.cmpi slt, %16, %17 : vector<1x16xi32>
    %c0 = arith.constant 0 : index
    %c0_4 = arith.constant 0 : index
    %c0_5 = arith.constant 0 : index
    %19 = vector.load %arg4[%c0, %c0_4, %c0_5] : memref<1x16x8xf32, #tpu.memory_space<vmem>>, vector<1x16x8xf32>
    %c0_6 = arith.constant 0 : index
    %c0_7 = arith.constant 0 : index
    %c0_8 = arith.constant 0 : index
    %20 = vector.load %arg5[%c0_6, %c0_7, %c0_8] : memref<1x16x8xf32, #tpu.memory_space<vmem>>, vector<1x16x8xf32>
    %c0_9 = arith.constant 0 : index
    %c0_10 = arith.constant 0 : index
    %c0_11 = arith.constant 0 : index
    %21 = vector.load %arg6[%c0_9, %c0_10, %c0_11] : memref<1x16x8xf32, #tpu.memory_space<vmem>>, vector<1x16x8xf32>
    %22 = arith.subf %20, %19 : vector<1x16x8xf32>
    %23 = math.absf %22 : vector<1x16x8xf32>
    %cst = arith.constant dense<0.000000e+00> : vector<1x16xf32>
    %24 = vector.multi_reduction <add>, %23, %cst [2] : vector<1x16x8xf32> to vector<1x16xf32>
    %25 = arith.subf %21, %19 : vector<1x16x8xf32>
    %26 = math.absf %25 : vector<1x16x8xf32>
    %cst_12 = arith.constant dense<0.000000e+00> : vector<1x16xf32>
    %27 = vector.multi_reduction <add>, %26, %cst_12 [2] : vector<1x16x8xf32> to vector<1x16xf32>
    %c0_13 = arith.constant 0 : index
    %28 = memref.load %arg12[%c0_13] : memref<4xf32, #tpu.memory_space<smem>>
    %cst_14 = arith.constant 0.000000e+00 : f32
    %29 = vector.broadcast %cst_14 : f32 to vector<1x16xf32>
    %30 = arith.select %18, %24, %29 : vector<1x16xi1>, vector<1x16xf32>
    %31 = vector.shape_cast %30 : vector<1x16xf32> to vector<1x1x16xf32>
    %cst_15 = arith.constant dense<0.000000e+00> : vector<1xf32>
    %32 = vector.multi_reduction <add>, %31, %cst_15 [1, 2] : vector<1x1x16xf32> to vector<1xf32>
    %33 = vector.shape_cast %32 : vector<1xf32> to vector<1x1x1xf32>
    %34 = vector.extract %33[0, 0, 0] : f32 from vector<1x1x1xf32>
    %35 = arith.addf %28, %34 : f32
    %c0_16 = arith.constant 0 : index
    %36 = memref.load %arg12[%c0_16] : memref<4xf32, #tpu.memory_space<smem>>
    memref.store %35, %arg12[%c0_16] : memref<4xf32, #tpu.memory_space<smem>>
    %c1 = arith.constant 1 : index
    %37 = memref.load %arg12[%c1] : memref<4xf32, #tpu.memory_space<smem>>
    %cst_17 = arith.constant 0.000000e+00 : f32
    %38 = vector.broadcast %cst_17 : f32 to vector<1x16xf32>
    %39 = arith.select %18, %27, %38 : vector<1x16xi1>, vector<1x16xf32>
    %40 = vector.shape_cast %39 : vector<1x16xf32> to vector<1x1x16xf32>
    %cst_18 = arith.constant dense<0.000000e+00> : vector<1xf32>
    %41 = vector.multi_reduction <add>, %40, %cst_18 [1, 2] : vector<1x1x16xf32> to vector<1xf32>
    %42 = vector.shape_cast %41 : vector<1xf32> to vector<1x1x1xf32>
    %43 = vector.extract %42[0, 0, 0] : f32 from vector<1x1x1xf32>
    %44 = arith.addf %37, %43 : f32
    %c1_19 = arith.constant 1 : index
    %45 = memref.load %arg12[%c1_19] : memref<4xf32, #tpu.memory_space<smem>>
    memref.store %44, %arg12[%c1_19] : memref<4xf32, #tpu.memory_space<smem>>
    %c0_i32_20 = arith.constant 0 : i32
    %46 = arith.cmpi eq, %arg1, %c0_i32_20 : i32
    %47 = arith.extui %46 : i1 to i32
    %c0_i32_21 = arith.constant 0 : i32
    %48 = arith.cmpi ne, %47, %c0_i32_21 : i32
    scf.if %48 {
      %49 = tpu.iota {dimensions = array<i32: 1>} : vector<1x4x1xi32>
      %cst_22 = arith.constant 0.000000e+00 : f32
      %50 = vector.broadcast %cst_22 : f32 to vector<1x4x1xf32>
      %c0_i32_23 = arith.constant 0 : i32
      %51 = vector.broadcast %c0_i32_23 : i32 to vector<1x4x1xi32>
      %52 = arith.cmpi eq, %49, %51 : vector<1x4x1xi32>
      %c0_24 = arith.constant 0 : index
      %53 = memref.load %arg12[%c0_24] : memref<4xf32, #tpu.memory_space<smem>>
      %54 = vector.broadcast %53 : f32 to vector<1x4x1xf32>
      %55 = arith.select %52, %54, %50 : vector<1x4x1xi1>, vector<1x4x1xf32>
      %c1_i32_25 = arith.constant 1 : i32
      %56 = vector.broadcast %c1_i32_25 : i32 to vector<1x4x1xi32>
      %57 = arith.cmpi eq, %49, %56 : vector<1x4x1xi32>
      %c1_26 = arith.constant 1 : index
      %58 = memref.load %arg12[%c1_26] : memref<4xf32, #tpu.memory_space<smem>>
      %59 = vector.broadcast %58 : f32 to vector<1x4x1xf32>
      %60 = arith.select %57, %59, %55 : vector<1x4x1xi1>, vector<1x4x1xf32>
      %c2_i32 = arith.constant 2 : i32
      %61 = vector.broadcast %c2_i32 : i32 to vector<1x4x1xi32>
      %62 = arith.cmpi eq, %49, %61 : vector<1x4x1xi32>
      %c2 = arith.constant 2 : index
      %63 = memref.load %arg12[%c2] : memref<4xf32, #tpu.memory_space<smem>>
      %64 = vector.broadcast %63 : f32 to vector<1x4x1xf32>
      %65 = arith.select %62, %64, %60 : vector<1x4x1xi1>, vector<1x4x1xf32>
      %c3_i32 = arith.constant 3 : i32
      %66 = vector.broadcast %c3_i32 : i32 to vector<1x4x1xi32>
      %67 = arith.cmpi eq, %49, %66 : vector<1x4x1xi32>
      %c3 = arith.constant 3 : index
      %68 = memref.load %arg12[%c3] : memref<4xf32, #tpu.memory_space<smem>>
      %69 = vector.broadcast %68 : f32 to vector<1x4x1xf32>
      %70 = arith.select %67, %69, %65 : vector<1x4x1xi1>, vector<1x4x1xf32>
      %c0_27 = arith.constant 0 : index
      %c0_28 = arith.constant 0 : index
      %c0_29 = arith.constant 0 : index
      %71 = vector.load %arg11[%c0_27, %c0_28, %c0_29] : memref<1x4x1xf32, #tpu.memory_space<vmem>>, vector<1x4x1xf32>
      tpu.vector_store %arg11[%c0_27, %c0_28, %c0_29], %70 {strides = array<i32>} : memref<1x4x1xf32, #tpu.memory_space<vmem>>, vector<1x4x1xf32>,
    } else {
    }
    return
  }
  func.func @transform_0(%arg0: i32, %arg1: i32, %arg2: memref<2xi32, #tpu.memory_space<smem>>, %arg3: memref<2xi32, #tpu.memory_space<smem>>) -> (i32, i32, i32) {
    %c0_i32 = arith.constant 0 : i32
    %c0_i32_0 = arith.constant 0 : i32
    return %arg0, %arg1, %c0_i32 : i32, i32, i32
  }
  func.func @transform_1(%arg0: i32, %arg1: i32, %arg2: memref<2xi32, #tpu.memory_space<smem>>, %arg3: memref<2xi32, #tpu.memory_space<smem>>) -> (i32, i32, i32) {
    %c0_i32 = arith.constant 0 : i32
    %c0_i32_0 = arith.constant 0 : i32
    return %arg0, %arg1, %c0_i32 : i32, i32, i32
  }
  func.func @transform_2(%arg0: i32, %arg1: i32, %arg2: memref<2xi32, #tpu.memory_space<smem>>, %arg3: memref<2xi32, #tpu.memory_space<smem>>) -> (i32, i32, i32) {
    %c0_i32 = arith.constant 0 : i32
    %c0_i32_0 = arith.constant 0 : i32
    return %arg0, %arg1, %c0_i32 : i32, i32, i32
  }
  func.func @transform_3(%arg0: i32, %arg1: i32, %arg2: memref<2xi32, #tpu.memory_space<smem>>, %arg3: memref<2xi32, #tpu.memory_space<smem>>) -> (i32, i32, i32) {
    %c0_i32 = arith.constant 0 : i32
    %c0_i32_0 = arith.constant 0 : i32
    %c0_i32_1 = arith.constant 0 : i32
    return %arg0, %c0_i32, %c0_i32_0 : i32, i32, i32
  }
  func.func @transform_4(%arg0: i32, %arg1: i32, %arg2: memref<2xi32, #tpu.memory_space<smem>>, %arg3: memref<2xi32, #tpu.memory_space<smem>>) -> (i32, i32, i32) {
    %c0_i32 = arith.constant 0 : i32
    %c0_i32_0 = arith.constant 0 : i32
    %c0_i32_1 = arith.constant 0 : i32
    return %arg0, %c0_i32, %c0_i32_0 : i32, i32, i32
  }
  func.func @transform_5(%arg0: i32, %arg1: i32, %arg2: memref<2xi32, #tpu.memory_space<smem>>, %arg3: memref<2xi32, #tpu.memory_space<smem>>) -> (i32, i32, i32) {
    %c0_i32 = arith.constant 0 : i32
    %c0_i32_0 = arith.constant 0 : i32
    %c0_i32_1 = arith.constant 0 : i32
    return %arg0, %c0_i32, %c0_i32_0 : i32, i32, i32
  }
  func.func @transform_6(%arg0: i32, %arg1: i32, %arg2: memref<2xi32, #tpu.memory_space<smem>>, %arg3: memref<2xi32, #tpu.memory_space<smem>>) -> (i32, i32, i32) {
    %c0_i32 = arith.constant 0 : i32
    %c0_i32_0 = arith.constant 0 : i32
    %c0_i32_1 = arith.constant 0 : i32
    return %arg0, %c0_i32, %c0_i32_0 : i32, i32, i32
  }
  func.func @transform_7(%arg0: i32, %arg1: i32, %arg2: memref<2xi32, #tpu.memory_space<smem>>, %arg3: memref<2xi32, #tpu.memory_space<smem>>) -> (i32, i32, i32) {
    %c0_i32 = arith.constant 0 : i32
    %c0_i32_0 = arith.constant 0 : i32
    %c0_i32_1 = arith.constant 0 : i32
    return %arg0, %c0_i32, %c0_i32_0 : i32, i32, i32
  }
}

</mosaic_0001>

<bundles_post_ra>
// kernel: tpu_custom_call.1
= control target key start
LH: loop header
LB: loop body
LE: loop exit
PB: predicated region body
PF: predicated region fallthrough
CT: control target
= control target key end

     0   :  { %s1007_s0 = inlined_call_operand.vmem [shape: s32[2], index: 0, kind: input, shape index: {}]   ;;  %s1008_s2 = inlined_call_operand.vmem [shape: f32[2,16,8], index: 2, kind: input, shape index: {}]   ;;  %s1009_s3 = inlined_call_operand.vmem [shape: f32[2,16,8], index: 3, kind: input, shape index: {}]   ;;  %s1010_s4 = inlined_call_operand.vmem [shape: f32[2,16,8], index: 4, kind: input, shape index: {}]   ;;  %s1011_s5 = inlined_call_operand.vmem [shape: f32[2,1,8], index: 5, kind: input, shape index: {}]   ;;  %s1012_s6 = inlined_call_operand.vmem [shape: s32[2,1,8], index: 6, kind: input, shape index: {}]   ;;  %s1013_s7 = inlined_call_operand.vmem [shape: f32[2,1,16], index: 7, kind: input, shape index: {}]   ;;  %s1014_s8 = inlined_call_operand.vmem [shape: f32[2,1,16], index: 8, kind: input, shape index: {}]   ;;  %s1015_s9 = inlined_call_operand.vmem [shape: f32[2,4,1], index: 9, kind: output, shape index: {}]   ;;  %s1016_s1 = inlined_call_operand.vmem [shape: s32[2], index: 1, kind: input, shape index: {}]  }
   0x1   :  { %s14_s11 = sshll.u32 %s1007_s0, 4  ;;  %s18_s14 = sshll.u32 %s1016_s1, 4  ;;  %s15_s11 = int_to_ptr.vmem [resolvable:$true] %s14_s11  ;;  %s19_s14 = int_to_ptr.vmem [resolvable:$true] %s18_s14 }
   0x2   :  { %s815_s15 = scalar_lea.vmem %s15_s11, 16  ;;  %p820_p1 = scmp.lt.s32.totalorder %s15_s11, %s15_s11 }
   0x3   :  { %p816_p0 = scmp.ne.s32.totalorder %s15_s11, %s815_s15  ;;  %p821_p2 = scmp.lt.s32.totalorder %s815_s15, %s815_s15 }
   0x5   :  { %p822_p3 = por %p821_p2, %p820_p1 }
   0x7   :  { %p823_p4 = pnand %p822_p3, %p816_p0 }
   0x9   :  { %826 = shalt.err (!%p823_p4)  }
   0xa   :  { %s865_s16 = smov [#allocation4]   ;;  %s827_s17 = scalar_lea.vmem %s19_s14, 16 }
   0xb   :  { %17 = dma.vmem_to_smem %s15_s11, 16, %s865_s16, [#allocation3] }
   0xc   :  { %p828_p5 = scmp.ne.s32.totalorder %s19_s14, %s827_s17  ;;  %p832_p6 = scmp.lt.s32.totalorder %s19_s14, %s19_s14 }
   0xd   :  { %p833_p7 = scmp.lt.s32.totalorder %s827_s17, %s827_s17 }
   0xf   :  { %p834_p8 = por %p833_p7, %p832_p6 }
  0x11   :  { %p835_p9 = pnand %p834_p8, %p828_p5 }
  0x13   :  { %838 = shalt.err (!%p835_p9)  }
  0x14   :  { %s866_s0 = smov [#allocation5]  }
  0x15   :  { %21 = dma.vmem_to_smem %s19_s14, 16, %s866_s0, [#allocation3] }
  0x16   :  { %851 = dma.done.wait [#allocation3], 32 }
  0x17   :  { %852 = vsyncadd [#allocation3], 4294967264 }
  0x18   :  { %23 = sfence }
  0x19   :  { %s923_s1 = smov 0   ;;  %s925_s18 = smov 0  }
  0x1a   :  { %s927_s19 = smov 0  }
  0x1b LB: > { %s41_s20 = sadd.s32 1, %s859_s18  ;;  %p760_p10 = scmp.ge.s32.totalorder %s863_s19, 1  ;;  %s863_s19 = sphi %s927_s19, %s29_s19   ;;  %s859_s18 = sphi %s925_s18, %s1018_s18   ;;  %s855_s1 = sphi %s923_s1, %s1017_s1  }
  0x1c   : > { %p43_p11 = scmp.ge.s32.totalorder %s41_s20, 2  ;;  %p334_p12 = scmp.lt.s32.totalorder %s863_s19, 3 }
  0x1e   : > { %s1020_s20 = smov (%p43_p11, %s41_s20), 0  ;;  %p335_p13 = pnand %p760_p10, %p334_p12 }
  0x1f   : > { %p400_p0 = scmp.lt.s32.totalorder (!%p335_p13), %s855_s1, 1  ;;  %vm523_vm0 = vcmask (!%p335_p13), 64512   ;;  %v455_v23 = vlaneseq (!%p335_p13)  ;;  %s453_s17 = sld [smem:[#allocation5 + %s855_s1]] (!%p335_p13)  ;;  %vm467_vm2 = vcmask (!%p335_p13), 57344   ;;  %vm488_vm3 = vcmask (!%p335_p13), 122880  }
  0x20   : > { %338 = sbr.rel (%p335_p13) target bundleno = 412 (0x19c), region = 48  ;;  %s504_s27 = sld [smem:[#allocation4 + %s855_s1]] (!%p335_p13)  ;;  %vm552_vm5 = vcmask (!%p335_p13), 130112   ;;  %vm615_vm10 = vcmask (!%p335_p13), 3072  }
  0x21   : > { %v456_v26 = vand.u32 (!%p335_p13), 127, %v455_v23  ;;  %v980_v40 = vshrl.u32 (!%p335_p13), %v455_v23, 7 }
  0x23   : > { %v547_v41 = vadd.s32 (!%p335_p13), 4294967288, %v456_v26  ;;  %vm503_vm4 = vcmp.eq.s32.totalorder (!%p335_p13), %v980_v40, 0  ;;  %v545_v44 = vsub.s32 (!%p335_p13), %v456_v26, %v980_v40  ;;  %vm603_vm7 = vcmp.eq.s32.totalorder (!%p335_p13), %v980_v40, 1 }
  0x24   : > { %vm607_vm8 = vcmp.eq.s32.totalorder (!%p335_p13), %v980_v40, 2  ;;  %vm611_vm9 = vcmp.eq.s32.totalorder (!%p335_p13), %v980_v40, 3 }
  0x25   : > { %v454_v31 = vstv (!%p335_p13), %s453_s17  ;;  %v550_v46 = vsub.s32 (!%p335_p13), %v547_v41, %v980_v40 }
  0x26   : > { %vm457_vm1 = vcmp.lt.s32.totalorder (!%p335_p13), %v456_v26, %v454_v31  ;;  %v505_v42 = vstv (!%p335_p13), %s504_s27 }
  0x27   : > { %s945_s21 = scalar_select %p400_p0, %s855_s1, 1  ;;  %v506_v47 = vsel %vm503_vm4, %v505_v42, 0 }
  0x28   : > { %vm512_vm6 = vcmp.lt.s32.totalorder %v456_v26, %v506_v47 }
  0x29   : > { %s774_s22 = sshll.u32 %s945_s21, 4  ;;  %s434_s25 = scalar_lea.vmem %s1012_s6, %s945_s21 }
  0x2a   : > { %s407_s28 = scalar_lea.vmem %s1008_s2, %s774_s22  ;;  %s427_s10 = scalar_lea.vmem %s1010_s4, %s774_s22  ;;  %v458_v0 = vld [vmem:[%s434_s25] sm:$0x1] }
  0x2b   : > { %v513_v1 = vld [vmem:[%s407_s28] sm:$0xff]  ;;  %s417_s13 = scalar_lea.vmem %s1009_s3, %s774_s22  ;;  %v514_v3 = vld [vmem:[%s407_s28 + $0x8] sm:$0xff]  ;;  %v459_v4 = vcvt.s32.f32 %v458_v0  ;;  %s440_s16 = scalar_lea.vmem %s1014_s8, %s945_s21 }
  0x2c   : > { %v517_v2 = vld [vmem:[%s427_s10] sm:$0xff]  ;;  %v518_v7 = vld [vmem:[%s427_s10 + $0x8] sm:$0xff]  ;;  %s431_s23 = scalar_lea.vmem %s1011_s5, %s945_s21  ;;  %s437_s26 = scalar_lea.vmem %s1013_s7, %s945_s21 }
  0x2d   : > { %v530_v5 = vsub.f32 %v517_v2, %v513_v1  ;;  %v515_v6 = vld [vmem:[%s417_s13] sm:$0xff]  ;;  %v516_v8 = vld [vmem:[%s417_s13 + $0x8] sm:$0xff]  ;;  %v531_v10 = vsub.f32 %v518_v7, %v514_v3  ;;  %v460_v12 = vadd.f32 1.0, %v459_v4  ;;  %s767_s30 = sshll.u32 %s945_s21, 2 }
  0x2e   : > { %v519_v9 = vsub.f32 %v515_v6, %v513_v1  ;;  %v520_v11 = vsub.f32 %v516_v8, %v514_v3  ;;  %v481_v18 = vld [vmem:[%s440_s16] sm:$0x1]  ;;  %s444_s13 = scalar_lea.vmem %s1015_s9, %s767_s30 }
  0x2f   : > { %v532_v13 = vand.u32 2147483647, %v530_v5  ;;  %v533_v15 = vand.u32 2147483647, %v531_v10  ;;  %811 = vlog2.f32 %v460_v12  ;;  %v485_v20 = vmul.f32 1.442695, %v481_v18 }
  0x30   : > { %v521_v14 = vand.u32 2147483647, %v519_v9  ;;  %v522_v16 = vand.u32 2147483647, %v520_v11  ;;  %v480_v24 = vld [vmem:[%s437_s26] sm:$0x1] }
  0x31   : > { %v534_v17 = vsel %vm523_vm0, %v532_v13, 0.0  ;;  %v537_v21 = vsel %vm523_vm0, %v533_v15, 0.0  ;;  %813 = vpow2.f32 %v485_v20  ;;  %v463_v27 = vld [vmem:[%s431_s23] sm:$0x1]  ;;  %v482_v28 = vadd.f32 1.0, %v481_v18 }
  0x32   : > { %535 = vadd.xlane.f32.xlu1 %v534_v17  ;;  %v524_v19 = vsel %vm523_vm0, %v521_v14, 0.0  ;;  %v527_v22 = vsel %vm523_vm0, %v522_v16, 0.0  ;;  %v483_v29 = vmul.f32 %v480_v24, %v480_v24 }
  0x33   : > { %525 = vadd.xlane.f32.xlu0 %v524_v19 }
  0x34   : > { %v484_v32 = vsub.f32 %v482_v28, %v483_v29 }
  0x36   : > { %538 = vadd.xlane.f32.xlu1 %v537_v21 }
  0x37   : > { %528 = vadd.xlane.f32.xlu0 %v527_v22 }
  0x39   : > { %v812_v25 = vpop.eup %811 }
  0x3a   : > { %v462_v30 = vmul.f32 0.6931472, %v812_v25 }
  0x3b   : > { %v814_v34 = vpop.eup %813 }
  0x3c   : > { %v464_v33 = vsub.f32 %v463_v27, %v462_v30  ;;  %v487_v36 = vsub.f32 %v484_v32, %v814_v34 }
  0x3e   : > { %v465_v35 = vmul.f32 %v464_v33, %v464_v33  ;;  %v489_v38 = vsel %vm488_vm3, %v487_v36, 0.0 }
  0x3f   : > { %490 = vadd.xlane.f32.xlu1 %v489_v38 }
  0x40   : > { %v466_v37 = vsel %vm457_vm1, %v465_v35, 0.0 }
  0x41   : > { %v468_v39 = vsel %vm467_vm2, %v466_v37, 0.0 }
  0x42   : > { %469 = vadd.xlane.f32.xlu0 %v468_v39 }
  0xbf   : > { %v536_v43 = vpop.xlane.xlu1 %535 }
  0xc0   : > { %v526_v45 = vpop.xlane.xlu0 %525  ;;  %v576_v49 = vrot.slane %v536_v43, %v545_v44 }
  0xc1   : > { %v546_v52 = vrot.slane %v526_v45, %v545_v44 }
  0xc3   : > { %v539_v48 = vpop.xlane.xlu1 %538 }
  0xc4   : > { %v580_v50 = vrot.slane %v539_v48, %v550_v46  ;;  %v529_v51 = vpop.xlane.xlu0 %528 }
  0xc5   : > { %v551_v53 = vrot.slane %v529_v51, %v550_v46 }
  0xc6   : > { %v581_v54 = vsel %vm552_vm5, %v580_v50, %v576_v49 }
  0xc7   : > { %v583_v55 = vsel %vm512_vm6, %v581_v54, 0.0  ;;  %v553_v56 = vsel %vm552_vm5, %v551_v53, %v546_v52 }
  0xc8   : > { %v584_v57 = vsel %vm488_vm3, %v583_v55, 0.0  ;;  %v555_v58 = vsel %vm512_vm6, %v553_v56, 0.0 }
  0xc9   : > { %585 = vadd.xlane.f32.xlu1 %v584_v57  ;;  %v557_v59 = vsel %vm488_vm3, %v555_v58, 0.0 }
  0xca   : > { %558 = vadd.xlane.f32.xlu0 %v557_v59 }
  0xcc   : > { %v491_v60 = vpop.xlane.xlu1 %490 }
  0xcd   : > { %v492_v62 = vrot.slane %v491_v60, 4 }
  0xcf   : > { %v470_v61 = vpop.xlane.xlu0 %469  ;;  %v493_v0 = vadd.f32 %v492_v62, %v491_v60 }
  0xd0   : > { %v471_v63 = vrot.slane %v470_v61, 4 }
  0xd1   : > { %v494_v2 = vrot.slane %v493_v0, 2 }
  0xd2   : > { %v472_v1 = vadd.f32 %v471_v63, %v470_v61 }
  0xd3   : > { %v495_v4 = vadd.f32 %v494_v2, %v493_v0 }
  0xd4   : > { %v473_v3 = vrot.slane %v472_v1, 2 }
  0xd5   : > { %v496_v6 = vrot.slane %v495_v4, 1 }
  0xd6   : > { %v474_v5 = vadd.f32 %v473_v3, %v472_v1 }
  0xd7   : > { %v497_v8 = vadd.f32 %v496_v6, %v495_v4 }
  0xd8   : > { %v475_v7 = vrot.slane %v474_v5, 1 }
  0xda   : > { %v476_v9 = vadd.f32 %v475_v7, %v474_v5 }
  0xdc   : > { %777 = vpush %v476_v9 }
  0xdd   : > { %779 = vpush %v497_v8 }
 0x10d   : > { %s778_s1 = spop %777 }
 0x10e   : > { %s780_s28 = spop %779  ;;  %v609_v27 = vstv %s778_s1 }
 0x10f   : > { %v613_v29 = vstv %s780_s28 }
 0x156   : > { %v586_v10 = vpop.xlane.xlu1 %585 }
 0x157   : > { %v587_v11 = vrot.slane %v586_v10, 4  ;;  %v559_v12 = vpop.xlane.xlu0 %558 }
 0x158   : > { %v560_v13 = vrot.slane %v559_v12, 4 }
 0x159   : > { %v588_v14 = vadd.f32 %v587_v11, %v586_v10 }
 0x15a   : > { %v561_v15 = vadd.f32 %v560_v13, %v559_v12 }
 0x15b   : > { %v589_v16 = vrot.slane %v588_v14, 2 }
 0x15c   : > { %v562_v17 = vrot.slane %v561_v15, 2 }
 0x15d   : > { %v590_v18 = vadd.f32 %v589_v16, %v588_v14 }
 0x15e   : > { %v563_v19 = vadd.f32 %v562_v17, %v561_v15 }
 0x15f   : > { %v591_v20 = vrot.slane %v590_v18, 1 }
 0x160   : > { %v564_v21 = vrot.slane %v563_v19, 1 }
 0x161   : > { %v592_v22 = vadd.f32 %v591_v20, %v590_v18 }
 0x162   : > { %v565_v23 = vadd.f32 %v564_v21, %v563_v19 }
 0x164   : > { %781 = vpush %v565_v23 }
 0x165   : > { %783 = vpush %v592_v22 }
 0x195   : > { %s782_s29 = spop %781 }
 0x196   : > { %v601_v24 = vstv %s782_s29  ;;  %s784_s10 = spop %783 }
 0x197   : > { %v602_v25 = vsel %vm503_vm4, %v601_v24, 0.0  ;;  %v605_v26 = vstv %s784_s10 }
 0x198   : > { %v606_v28 = vsel %vm603_vm7, %v605_v26, %v602_v25 }
 0x199   : > { %v610_v30 = vsel %vm607_vm8, %v609_v27, %v606_v28 }
 0x19a   : > { %v614_v31 = vsel %vm611_vm9, %v613_v29, %v610_v30 }
 0x19b   : > { %616 = vst.msk [vmem:[%s444_s13] sm:$0xf] %vm615_vm10, %v614_v31 }
 0x19c PF: > { %s29_s19 = sadd.s32 1, %s863_s19   ;;  %s1017_s1 = smov %s859_s18 }
 0x19d   : > { %p26_p1 = scmp.ge.s32.totalorder %s29_s19, 4   ;;  %s1018_s18 = smov %s1020_s20 }
 0x19f   :  { %28 = sbr.rel (!%p26_p1) target bundleno = 27 (0x1b), region = 110 }

</bundles_post_ra>
